<compile_context>
chip_gen: v5e
topology: v5e:2x2
jax: 0.10.0
libtpu: 0.0.40
codegen_flags: <defaults>
</compile_context>

<pallas_src>
import functools

import jax
import jax.numpy as jnp
from jax.experimental import pallas as pl
from jax.experimental.pallas import tpu as pltpu


# ----------------------------- kernel ----------------------------------------
def _rmsnorm_kernel(x_ref, w_ref, o_ref, *, eps, inv_d):
    # x_ref: (bm, D) input dtype; w_ref: (1, D) weight dtype; o_ref: (bm, D) out dtype.
    x = x_ref[...].astype(jnp.float32)                       # torch: x.float()
    ss = jnp.sum(x * x, axis=-1, keepdims=True)               # XLU lane reduce
    normed = x * jax.lax.rsqrt(ss * inv_d + eps)               # EUP rsqrt; *1/D, no divide
    normed = normed.astype(x_ref.dtype)                        # torch: .type_as(x)
    o_ref[...] = (normed * w_ref[...]).astype(o_ref.dtype)     # torch: * weight


# ----------------------------- helpers ----------------------------------------
def _round_up(n, m):
    return (n + m - 1) // m * m


def _tpu_vmem_config():
    """Generation-aware (vmem_limit_bytes, tile_budget_bytes, min_row_tiles)."""
    MIB = 1024 * 1024
    vmem_cap = None
    try:
        info = pltpu.get_tpu_info()
        vmem_cap = getattr(info, "vmem_capacity_bytes", None)
    except Exception:
        vmem_cap = None
    if vmem_cap is None:
        try:
            kind = jax.devices()[0].device_kind.lower()
        except Exception:
            kind = ""
        vmem_cap = 64 * MIB if "7" in kind else 128 * MIB
    if vmem_cap <= 64 * MIB:
        # v7x-class: 64 MiB/TC -> leave headroom for compiler scratch and make
        # sure both TensorCores get at least one row tile each.
        return 44 * MIB, 14 * MIB, 2
    # v5e / v6e: 128 MiB physical; explicit limit beats the small scoped default.
    return 96 * MIB, 28 * MIB, 1


# ----------------------------- wrapper ----------------------------------------
def rmsnorm(x, weight, eps: float = 1e-5, block_rows: int = 1024):
    """RMSNorm over the last axis of `x` with learnable `weight` (shape [D])."""
    orig_shape = x.shape
    D = orig_shape[-1]
    M = max(1, x.size // D)
    x2 = x.reshape(M, D)
    # torch: (normed.type_as(x)) * weight -> usual dtype promotion
    out_dtype = jnp.result_type(x.dtype, weight.dtype)

    vmem_limit, tile_budget, min_tiles = _tpu_vmem_config()

    # Sublane packing of the streamed activation dtype: f32->8, bf16->16, i8->32.
    pack = max(8, 32 // jnp.dtype(x.dtype).itemsize)
    itemsize = max(jnp.dtype(x.dtype).itemsize, jnp.dtype(out_dtype).itemsize)
    # 2 in-buffers + 2 out-buffers (double-buffered) must fit the tile budget.
    bm_cap = max(pack, (tile_budget // (4 * D * itemsize)) // pack * pack)
    bm = min(_round_up(block_rows, pack), bm_cap)
    bm = min(bm, _round_up(M, pack))                  # don't oversize tiny inputs
    # v7x megacore: ensure >= 2 row tiles so both TensorCores get work.
    if pl.cdiv(M, bm) < min_tiles and M >= min_tiles * pack:
        bm = _round_up(pl.cdiv(M, min_tiles), pack)

    grid = (pl.cdiv(M, bm),)  # ragged tail tile handled by Pallas (no pad / slice)

    out = pl.pallas_call(
        functools.partial(_rmsnorm_kernel, eps=eps, inv_d=1.0 / D),
        out_shape=jax.ShapeDtypeStruct((M, D), out_dtype),
        grid=grid,
        in_specs=[
            pl.BlockSpec((bm, D), lambda i: (i, 0)),   # stream activation rows
            pl.BlockSpec((1, D), lambda i: (0, 0)),    # weight stays VMEM-resident
        ],
        out_specs=pl.BlockSpec((bm, D), lambda i: (i, 0)),
        compiler_params=pltpu.CompilerParams(
            dimension_semantics=("parallel",),         # megacore sharding (v7x)
            vmem_limit_bytes=vmem_limit,               # generation-aware scoped VMEM
        ),
    )(x2, weight.reshape(1, D))

    return out.reshape(orig_shape)
    # TODO(synk): when this norm feeds a matmul, fuse it into that kernel to
    # avoid an extra read+write of the activation; standalone here because the
    # spec module is RMSNorm alone.


# ----------------------------- reference --------------------------------------
def rmsnorm_ref(x, weight, eps: float = 1e-5):
    xf = x.astype(jnp.float32)
    normed = xf * jax.lax.rsqrt(jnp.mean(xf * xf, axis=-1, keepdims=True) + eps)
    return normed.astype(x.dtype) * weight


# ----------------------------- main -------------------------------------------
if __name__ == "__main__":
    key = jax.random.PRNGKey(0)
    k1, k2, k3, k4, k5 = jax.random.split(key, 5)

    # 1) f32, small transformer-ish shape (batch=2, seq=8, hidden=256); on v7x
    #    this splits into 2 row tiles so both TensorCores are exercised.
    x = jax.random.normal(k1, (2, 8, 256), dtype=jnp.float32)
    w = 1.0 + 0.1 * jax.random.normal(k2, (256,), dtype=jnp.float32)
    y = jax.block_until_ready(jax.jit(functools.partial(rmsnorm, eps=1e-5))(x, w))
    assert y.shape == x.shape and y.dtype == jnp.float32
    assert jnp.allclose(y, rmsnorm_ref(x, w), rtol=1e-5, atol=1e-5)

    # 2) bf16 activations + f32 weight (torch type_as + promotion semantics);
    #    M = 14 rows -> ragged tail tile, no pad/slice copies outside the kernel.
    xb = jax.random.normal(k3, (2, 7, 384), dtype=jnp.bfloat16)
    wb = 1.0 + 0.1 * jax.random.normal(k4, (384,), dtype=jnp.float32)
    yb = jax.block_until_ready(rmsnorm(xb, wb))
    assert yb.shape == xb.shape and yb.dtype == jnp.float32
    assert jnp.allclose(yb, rmsnorm_ref(xb, wb), rtol=2e-2, atol=2e-2)

    # 3) bf16 activations + bf16 weight (gpt-fast style): output stays bf16,
    #    avoiding f32 writeback traffic.
    xc = jax.random.normal(k5, (3, 5, 128), dtype=jnp.bfloat16)
    wc = jnp.ones((128,), jnp.bfloat16)
    yc = jax.block_until_ready(rmsnorm(xc, wc))
    assert yc.shape == xc.shape and yc.dtype == jnp.bfloat16
    assert jnp.allclose(yc.astype(jnp.float32),
                        rmsnorm_ref(xc, wc).astype(jnp.float32),
                        rtol=2e-2, atol=2e-2)

    assert bool(jnp.all(jnp.isfinite(y)))
    print("KERNEL_OK")
</pallas_src>

<mosaic_0001>
module attributes {stable_mosaic.version = 11 : i64} {
  func.func @_rmsnorm_kernel(%arg0: i32, %arg1: memref<16x256xf32, #tpu.memory_space<vmem>>, %arg2: memref<1x256xf32, #tpu.memory_space<vmem>>, %arg3: memref<16x256xf32, #tpu.memory_space<vmem>>) attributes {dimension_semantics = [#tpu.dimension_semantics<parallel>], iteration_bounds = array<i64: 1>, scalar_prefetch = 0 : i64, scratch_operands = 0 : i64, tpu.core_type = #tpu.core_type<tc>, window_params = [{transform_indices = @transform_0, window_bounds = array<i64: 16, 256>}, {pipeline_mode = #tpu.pipeline_mode<synchronous>, transform_indices = @transform_1, window_bounds = array<i64: 1, 256>}, {transform_indices = @transform_2, window_bounds = array<i64: 16, 256>}]} {
    %c0 = arith.constant 0 : index
    %c0_0 = arith.constant 0 : index
    %0 = vector.load %arg1[%c0, %c0_0] : memref<16x256xf32, #tpu.memory_space<vmem>>, vector<16x256xf32>
    %1 = arith.mulf %0, %0 : vector<16x256xf32>
    %cst = arith.constant dense<0.000000e+00> : vector<16xf32>
    %2 = vector.multi_reduction <add>, %1, %cst [1] : vector<16x256xf32> to vector<16xf32>
    %3 = vector.shape_cast %2 : vector<16xf32> to vector<16x1xf32>
    %cst_1 = arith.constant 3.906250e-03 : f32
    %4 = vector.broadcast %cst_1 : f32 to vector<16x1xf32>
    %5 = arith.mulf %3, %4 : vector<16x1xf32>
    %cst_2 = arith.constant 9.99999974E-6 : f32
    %6 = vector.broadcast %cst_2 : f32 to vector<16x1xf32>
    %7 = arith.addf %5, %6 : vector<16x1xf32>
    %8 = math.rsqrt %7 : vector<16x1xf32>
    %9 = vector.broadcast %8 : vector<16x1xf32> to vector<16x256xf32>
    %10 = arith.mulf %0, %9 : vector<16x256xf32>
    %c0_3 = arith.constant 0 : index
    %c0_4 = arith.constant 0 : index
    %11 = vector.load %arg2[%c0_3, %c0_4] : memref<1x256xf32, #tpu.memory_space<vmem>>, vector<1x256xf32>
    %12 = vector.broadcast %11 : vector<1x256xf32> to vector<16x256xf32>
    %13 = arith.mulf %10, %12 : vector<16x256xf32>
    %c0_5 = arith.constant 0 : index
    %c0_6 = arith.constant 0 : index
    %14 = vector.load %arg3[%c0_5, %c0_6] : memref<16x256xf32, #tpu.memory_space<vmem>>, vector<16x256xf32>
    tpu.vector_store %arg3[%c0_5, %c0_6], %13 {strides = array<i32>} : memref<16x256xf32, #tpu.memory_space<vmem>>, vector<16x256xf32>,
    return
  }
  func.func @transform_0(%arg0: i32) -> (i32, i32) {
    %c0_i32 = arith.constant 0 : i32
    %c0_i32_0 = arith.constant 0 : i32
    return %arg0, %c0_i32 : i32, i32
  }
  func.func @transform_1(%arg0: i32) -> (i32, i32) {
    %c0_i32 = arith.constant 0 : i32
    %c0_i32_0 = arith.constant 0 : i32
    %c0_i32_1 = arith.constant 0 : i32
    return %c0_i32, %c0_i32_0 : i32, i32
  }
  func.func @transform_2(%arg0: i32) -> (i32, i32) {
    %c0_i32 = arith.constant 0 : i32
    %c0_i32_0 = arith.constant 0 : i32
    return %arg0, %c0_i32 : i32, i32
  }
}

</mosaic_0001>

<bundles_post_ra>
// kernel: rmsnorm.1
= control target key start
LH: loop header
LB: loop body
LE: loop exit
PB: predicated region body
PF: predicated region fallthrough
CT: control target
= control target key end

     0   :  { %7 = vsyncpa [#allocation3], 0  ;;  %s197_s0 = inlined_call_operand.hbm [shape: f32[16,256], index: 0, kind: input, shape index: {}]   ;;  %s198_s1 = inlined_call_operand.vmem [shape: f32[1,256], index: 1, kind: input, shape index: {}]   ;;  %s199_s2 = inlined_call_operand.hbm [shape: f32[16,256], index: 2, kind: output, shape index: {}]  }
   0x1   :  { %8 = vsyncpa [#allocation4], 0  ;;  %s13_s11 = sshll.u32 %s197_s0, 4  ;;  %s163_s12 = smov [#allocation2]   ;;  %s14_s11 = int_to_ptr.hbm [resolvable:$true] %s13_s11 }
   0x2   :  { %s15_s13 = sshll.u32 %s163_s12, 4  ;;  %s164_s14 = smov 256   ;;  %s16_s13 = int_to_ptr.vmem [resolvable:$true] %s15_s13 }
   0x3   :  { %s165_s15 = smov 16  }
   0x4   :  { %21 = dma.hbm_to_vmem [thread:$0]  %s14_s11, 512, %s16_s13, [#allocation3], %s164_s14, %s164_s14, %s165_s15  }
   0x5   :  { %159 = dma.done.wait [#allocation3], 512  }
   0x6   :  { %160 = vsyncadd [#allocation3], 4294966784  ;;  %v28_v0 = vld [vmem:[#allocation2] sm:$0xff]  ;;  %v29_v1 = vld [vmem:[#allocation2 + $0x8] sm:$0xff]  ;;  %s90_s20 = sshll.u32 %s199_s2, 4  ;;  %s91_s20 = int_to_ptr.hbm [resolvable:$true] %s90_s20 }
   0x7   :  { %v32_v2 = vmul.f32 %v28_v0, %v28_v0  ;;  %v33_v3 = vmul.f32 %v29_v1, %v29_v1  ;;  %v30_v4 = vld [vmem:[#allocation2 + $0x10] sm:$0xff]  ;;  %v31_v5 = vld [vmem:[#allocation2 + $0x18] sm:$0xff]  ;;  %v70_v20 = vld [vmem:[%s198_s1] sm:$0x3]  ;;  %s166_s1 = smov [#allocation5]  }
   0x8   :  { %v34_v7 = vmul.f32 %v30_v4, %v30_v4  ;;  %v35_v8 = vmul.f32 %v31_v5, %v31_v5  ;;  %v72_v25 = vperm.slane %v70_v20, 0  ;;  %v73_v26 = vperm.slane %v70_v20, 1  ;;  %s88_s17 = sshll.u32 %s166_s1, 4  ;;  %s89_s17 = int_to_ptr.vmem [resolvable:$true] %s88_s17 }
   0x9   :  { %v36_v6 = vadd.f32 %v33_v3, %v32_v2 }
   0xa   :  { %v39_v9 = vadd.f32 %v35_v8, %v34_v7 }
   0xb   :  { %37 = vadd.xlane.f32.xlu0 %v36_v6 }
  0x13   :  { %40 = vadd.xlane.f32.xlu0 %v39_v9 }
  0x7e   :  { %v38_v10 = vpop.xlane.xlu0 %37 }
  0x7f   :  { %v42_v11 = vmul.f32 0.00390625, %v38_v10 }
  0x81   :  { %v44_v12 = vadd.f32 1e-05, %v42_v11 }
  0x83   :  { %107 = vrsqrt.f32 %v44_v12  ;;  %vm52_vm1 = vweird.f32 %v44_v12 }
  0x86   :  { %v41_v13 = vpop.xlane.xlu0 %40 }
  0x87   :  { %v43_v14 = vmul.f32 0.00390625, %v41_v13 }
  0x89   :  { %v108_v15 = vpop.eup %107  ;;  %v45_v16 = vadd.f32 1e-05, %v43_v14 }
  0x8a   :  { %v47_v17 = vmul.f32 %v108_v15, %v44_v12  ;;  %vm53_vm0 = vweird.f32 %v108_v15 }
  0x8b   :  { %109 = vrsqrt.f32 %v45_v16  ;;  %vm54_vm2 = vmor %vm52_vm1, %vm53_vm0  ;;  %vm62_vm4 = vweird.f32 %v45_v16 }
  0x8c   :  { %v48_v18 = vmul.f32 %v108_v15, %v47_v17 }
  0x8e   :  { %v49_v19 = vmul.f32 0.5, %v48_v18 }
  0x90   :  { %v50_v21 = vsub.f32 1.5, %v49_v19 }
  0x91   :  { %v110_v22 = vpop.eup %109 }
  0x92   :  { %v51_v23 = vmul.f32 %v108_v15, %v50_v21  ;;  %v57_v24 = vmul.f32 %v110_v22, %v45_v16  ;;  %vm63_vm3 = vweird.f32 %v110_v22 }
  0x93   :  { %vm64_vm5 = vmor %vm62_vm4, %vm63_vm3 }
  0x94   :  { %v55_v27 = vsel %vm54_vm2, %v108_v15, %v51_v23  ;;  %v58_v28 = vmul.f32 %v110_v22, %v57_v24 }
  0x95   :  { %v66_v29 = vmul.f32 %v55_v27, %v28_v0  ;;  %v67_v30 = vmul.f32 %v55_v27, %v29_v1 }
  0x96   :  { %v59_v31 = vmul.f32 0.5, %v58_v28 }
  0x97   :  { %v76_v32 = vmul.f32 %v72_v25, %v66_v29  ;;  %v77_v33 = vmul.f32 %v73_v26, %v67_v30 }
  0x98   :  { %v60_v34 = vsub.f32 1.5, %v59_v31 }
  0x99   :  { %80 = vst [vmem:[#allocation5] sm:$0xff] %v76_v32 }
  0x9a   :  { %81 = vst [vmem:[#allocation5 + $0x8] sm:$0xff] %v77_v33  ;;  %v61_v35 = vmul.f32 %v110_v22, %v60_v34 }
  0x9c   :  { %v65_v36 = vsel %vm64_vm5, %v110_v22, %v61_v35 }
  0x9d   :  { %v68_v37 = vmul.f32 %v65_v36, %v30_v4  ;;  %v69_v38 = vmul.f32 %v65_v36, %v31_v5 }
  0x9f   :  { %v78_v39 = vmul.f32 %v72_v25, %v68_v37  ;;  %v79_v40 = vmul.f32 %v73_v26, %v69_v38 }
  0xa1   :  { %82 = vst [vmem:[#allocation5 + $0x10] sm:$0xff] %v78_v39 }
  0xa2   :  { %83 = vst [vmem:[#allocation5 + $0x18] sm:$0xff] %v79_v40 }
  0xa3   :  { %96 = dma.vmem_to_hbm [thread:$0]  %s89_s17, 512, %s91_s20, [#allocation4], %s164_s14, %s164_s14, %s165_s15  }
  0xa4   :  { %161 = dma.done.wait [#allocation4], 512  }
  0xa5   :  { %162 = vsyncadd [#allocation4], 4294966784 }
  0xa6   :  { %101 = vsyncpa [#allocation3], 1 }
  0xa7   :  { %102 = vsyncpa [#allocation4], 1 }

</bundles_post_ra>
